<compile_context>
chip_gen: v7x
topology: tpu7x:2x2x1
jax: 0.10.0
libtpu: 0.0.40
codegen_flags: <defaults>
</compile_context>

<pallas_src>
import re
import functools

import jax
import jax.numpy as jnp
from jax.experimental import pallas as pl
from jax.experimental.pallas import tpu as pltpu

LANE = 128


def _round_up(x, m):
    return ((x + m - 1) // m) * m


def _cdiv(a, b):
    return -(-a // b)


@functools.lru_cache(maxsize=1)
def _tpu_hw():
    """(generation, physical VMEM bytes, usable VMEM budget) with safe fallbacks."""
    gen = 6
    try:
        kind = jax.devices()[0].device_kind.lower()
        m = re.search(r"(\d+)", kind)
        if m:
            gen = int(m.group(1))
    except Exception:
        pass
    vmem = None
    try:
        vmem = int(pltpu.get_tpu_info().vmem_capacity_bytes)
    except Exception:
        vmem = None
    if not vmem or vmem <= 0:
        vmem = (64 << 20) if gen >= 7 else (128 << 20)
    budget = min(int(vmem * 0.85), vmem - (10 << 20))
    budget = max(budget, 24 << 20)
    return gen, vmem, budget


# -----------------------------------------------------------------------------
# One-time parameter preparation (pad / cast / transpose / concat), hoisted out
# of the per-call path.
# -----------------------------------------------------------------------------
def prepare_memory_bridge(params, *, compute_dtype=jnp.bfloat16, vocab_chunk=None):
    f32 = jnp.float32
    compute_dtype = jnp.dtype(compute_dtype)
    cb = compute_dtype.itemsize

    V, D = params["emb"].shape
    H = params["mkeys"].shape[0]
    K = params["w_mlp"].shape[0]
    E = params["w_enc"].shape[1]
    Dd = params["w_dec"].shape[1]

    Kp = _round_up(K, LANE)
    Dp = _round_up(D, LANE)
    Fp = _round_up(E + Dd, LANE)

    _, _, budget = _tpu_hw()
    if vocab_chunk is None:
        # keep the double-buffered keys+emb streams under ~budget/4
        cv_cap = max(LANE, (budget // (16 * Dp * cb)) // LANE * LANE)
        vocab_chunk = min(2048, cv_cap)
    chunk_v = min(_round_up(vocab_chunk, LANE), _round_up(V, LANE))
    Vp = _round_up(V, chunk_v)
    n_chunks = Vp // chunk_v

    def pad2(a, r, c, dtype):
        a = jnp.asarray(a, dtype)
        return jnp.pad(a, ((0, r - a.shape[0]), (0, c - a.shape[1])))

    w_mlp = pad2(params["w_mlp"], Kp, Dp, compute_dtype)
    b_mlp = pad2(params["b_mlp"], 1, Dp, f32)
    # vocab-major key layout -> the streamed (chunk_v, Dp) block is contiguous
    mkeys = jnp.pad(
        jnp.transpose(jnp.asarray(params["mkeys"], compute_dtype), (0, 2, 1)),
        ((0, 0), (0, Vp - V), (0, Dp - D)))
    emb = pad2(params["emb"], Vp, Dp, compute_dtype)
    w_br = pad2(jnp.concatenate([params["w_enc"], params["w_dec"]], axis=1),
                Dp, Fp, compute_dtype)
    b_br = pad2(jnp.concatenate([params["b_enc"], params["b_dec"]], axis=1),
                1, Fp, f32)

    vbias = None
    if V % chunk_v != 0:   # additive mask row for zero-padded vocab columns
        col = jnp.arange(Vp, dtype=jnp.int32)[None, :]
        vbias = jnp.where(col < V, 0.0, -1e30).astype(f32)

    return {
        "_prepared": True,
        "compute_dtype": compute_dtype,
        "dims": dict(K=K, V=V, D=D, E=E, Dd=Dd, H=H, Kp=Kp, Dp=Dp, Fp=Fp,
                     Vp=Vp, chunk_v=chunk_v, n_chunks=n_chunks),
        "w_mlp": w_mlp, "b_mlp": b_mlp, "mkeys": mkeys, "emb": emb,
        "vbias": vbias, "w_br": w_br, "b_br": b_br,
    }


# -----------------------------------------------------------------------------
# Kernel body (all static config baked in; no captured jnp constants).
# -----------------------------------------------------------------------------
def _make_kernel(*, memory_hops, n_chunks, compute_dtype, has_mask, has_vbias):
    def kernel(*refs):
        it = iter(refs)
        logits_ref = next(it)
        mask_ref = next(it) if has_mask else None
        w_mlp_ref = next(it)
        b_mlp_ref = next(it)
        mkeys_ref = next(it)
        emb_ref = next(it)
        vbias_ref = next(it) if has_vbias else None
        w_br_ref = next(it)
        b_br_ref = next(it)
        out_ref = next(it)
        feat_sc = next(it)    # f32 feature carried across hops/chunks
        featc_sc = next(it)   # compute-dtype copy, refreshed at hop boundaries
        m_sc = next(it)
        l_sc = next(it)
        acc_sc = next(it)

        hop = pl.program_id(1)
        chunk = pl.program_id(2)

        # --- first step of each batch tile: feature = mlp(logits [* mask]) ----
        @pl.when(jnp.logical_and(hop == 0, chunk == 0))
        def _():
            x = logits_ref[...]
            if mask_ref is not None:
                x = x * mask_ref[...]
            f = (jnp.dot(x.astype(compute_dtype), w_mlp_ref[...],
                         preferred_element_type=jnp.float32)
                 + b_mlp_ref[...])
            feat_sc[...] = f
            featc_sc[...] = f.astype(compute_dtype)

        # --- start of each hop: reset online-softmax running state ------------
        @pl.when(chunk == 0)
        def _():
            m_sc[...] = jnp.full_like(m_sc[...], -1e30)
            l_sc[...] = jnp.zeros_like(l_sc[...])
            acc_sc[...] = jnp.zeros_like(acc_sc[...])

        # --- one vocab chunk of softmax(feat @ keys_hop) @ emb (online) --------
        # keys block is (chunk_v, Dp): contract last dims (transposed RHS).
        scores = jax.lax.dot_general(
            featc_sc[...], mkeys_ref[...],
            dimension_numbers=(((1,), (1,)), ((), ())),
            preferred_element_type=jnp.float32)                  # (tb, chunk_v)
        if vbias_ref is not None:
            scores = scores + vbias_ref[...]

        m_prev = m_sc[...]
        m_new = jnp.maximum(m_prev, jnp.max(scores, axis=-1, keepdims=True))
        alpha = jnp.exp(m_prev - m_new)
        p = jnp.exp(scores - m_new)
        l_sc[...] = alpha * l_sc[...] + jnp.sum(p, axis=-1, keepdims=True)
        acc_sc[...] = alpha * acc_sc[...] + jnp.dot(
            p.astype(compute_dtype), emb_ref[...],
            preferred_element_type=jnp.float32)
        m_sc[...] = m_new

        # --- end of each hop: residual add of the normalized retrieval ---------
        @pl.when(chunk == n_chunks - 1)
        def _():
            f = feat_sc[...] + acc_sc[...] / l_sc[...]
            feat_sc[...] = f
            featc_sc[...] = f.astype(compute_dtype)

        # --- very last step: fused encoder/decoder bridge projection -----------
        @pl.when(jnp.logical_and(hop == memory_hops - 1,
                                 chunk == n_chunks - 1))
        def _():
            out_ref[...] = (
                jnp.dot(featc_sc[...], w_br_ref[...],
                        preferred_element_type=jnp.float32)
                + b_br_ref[...]).astype(out_ref.dtype)

    return kernel


# -----------------------------------------------------------------------------
# Forward wrapper.
# -----------------------------------------------------------------------------
def memory_bridge_forward(logits, kwd_mask, params, *,
                          compute_dtype=jnp.bfloat16, vocab_chunk=None,
                          tile_b=None):
    """MemoryBridge forward.  Returns (e_feature, d_feature)."""
    if not (isinstance(params, dict) and params.get("_prepared")):
        params = prepare_memory_bridge(params, compute_dtype=compute_dtype,
                                       vocab_chunk=vocab_chunk)
    f32 = jnp.float32
    cdt = params["compute_dtype"]
    cb = cdt.itemsize
    d = params["dims"]
    E, Dd, H = d["E"], d["Dd"], d["H"]
    Kp, Dp, Fp = d["Kp"], d["Dp"], d["Fp"]
    chunk_v, n_chunks = d["chunk_v"], d["n_chunks"]
    has_mask = kwd_mask is not None
    has_vbias = params["vbias"] is not None

    B = logits.shape[0]
    B8 = _round_up(B, 8)
    gen, _, budget = _tpu_hw()

    # ---- VMEM-driven batch-tile sizing ---------------------------------------
    fixed = 2 * (Kp * Dp + Dp * Fp) * cb + 2 * (Dp + Fp) * 4     # constants (x2 bufs)
    fixed += 2 * 2 * chunk_v * Dp * cb                           # keys + emb streams
    if has_vbias:
        fixed += 2 * chunk_v * 4
    per_row = 2 * Kp * 4 + (2 * Kp * 4 if has_mask else 0)       # logits (+mask)
    per_row += 2 * Fp * 4                                        # output
    per_row += 2 * Dp * 4 + Dp * cb + 2 * LANE * 4               # feat/acc/featc/m/l
    per_row += 3 * chunk_v * 4                                   # scores/p temporaries

    if tile_b is None:
        tb = max(8, min(1024, ((budget - fixed - (4 << 20)) // per_row) // 8 * 8))
    else:
        tb = max(8, _round_up(tile_b, 8))
    tb = min(tb, B8)

    n_b = _cdiv(B8, tb)
    if gen >= 7:                       # 2 TensorCores per chip: keep both busy
        if n_b == 1 and B8 >= 16:      # with an even number of batch tiles.
            n_b = 2
        elif n_b > 1 and n_b % 2 == 1:
            n_b += 1
    tb = _round_up(_cdiv(B8, n_b), 8)
    Bp = n_b * tb

    est = fixed + tb * per_row
    vmem_limit = int(min(max(est + (8 << 20), 32 << 20), budget))

    # ---- per-call activation padding -----------------------------------------
    def pad2(a, r, c):
        a = jnp.asarray(a, f32)
        return jnp.pad(a, ((0, r - a.shape[0]), (0, c - a.shape[1])))

    batch_map = lambda i, h, c: (i, 0)
    const2 = lambda i, h, c: (0, 0)

    args = [pad2(logits, Bp, Kp)]
    in_specs = [pl.BlockSpec((tb, Kp), batch_map)]
    if has_mask:
        args.append(pad2(kwd_mask, Bp, Kp))
        in_specs.append(pl.BlockSpec((tb, Kp), batch_map))
    args += [params["w_mlp"], params["b_mlp"], params["mkeys"], params["emb"]]
    in_specs += [
        pl.BlockSpec((Kp, Dp), const2),                                   # mlp W
        pl.BlockSpec((1, Dp), const2),                                    # mlp b
        pl.BlockSpec((None, chunk_v, Dp), lambda i, h, c: (h, c, 0)),     # keys (streamed)
        pl.BlockSpec((chunk_v, Dp), lambda i, h, c: (c, 0)),              # emb (streamed)
    ]
    if has_vbias:
        args.append(params["vbias"])
        in_specs.append(pl.BlockSpec((1, chunk_v), lambda i, h, c: (0, c)))
    args += [params["w_br"], params["b_br"]]
    in_specs += [
        pl.BlockSpec((Dp, Fp), const2),                                   # fused bridge W
        pl.BlockSpec((1, Fp), const2),                                    # fused bridge b
    ]
    out_specs = pl.BlockSpec((tb, Fp), batch_map)

    scratch_shapes = [
        pltpu.VMEM((tb, Dp), f32),   # feature carry across hops/chunks
        pltpu.VMEM((tb, Dp), cdt),   # compute-dtype feature cache (hop boundaries)
        pltpu.VMEM((tb, 1), f32),    # online-softmax running max
        pltpu.VMEM((tb, 1), f32),    # online-softmax running denom
        pltpu.VMEM((tb, Dp), f32),   # online attn @ emb accumulator
    ]

    kernel = _make_kernel(memory_hops=H, n_chunks=n_chunks, compute_dtype=cdt,
                          has_mask=has_mask, has_vbias=has_vbias)

    fused = pl.pallas_call(
        kernel,
        out_shape=jax.ShapeDtypeStruct((Bp, Fp), f32),
        grid_spec=pltpu.PrefetchScalarGridSpec(
            num_scalar_prefetch=0, grid=(n_b, H, n_chunks),
            in_specs=in_specs, out_specs=out_specs,
            scratch_shapes=scratch_shapes),
        compiler_params=pltpu.CompilerParams(
            dimension_semantics=("parallel", "arbitrary", "arbitrary"),
            vmem_limit_bytes=vmem_limit),
    )(*args)

    return fused[:B, :E], fused[:B, E:E + Dd]


# -----------------------------------------------------------------------------
# Pure-JAX reference + parameter init (mirrors the torch module).
# -----------------------------------------------------------------------------
def reference_forward(logits, kwd_mask, params):
    x = logits if kwd_mask is None else logits * kwd_mask
    feat = x @ params["w_mlp"] + params["b_mlp"]
    for hop in range(params["mkeys"].shape[0]):
        attn = jax.nn.softmax(feat @ params["mkeys"][hop], axis=1)
        feat = feat + attn @ params["emb"]
    e_feature = feat @ params["w_enc"] + params["b_enc"]
    d_feature = feat @ params["w_dec"] + params["b_dec"]
    return e_feature, d_feature


def init_params(key, *, vocab, kwd_size, wd_emb_dim, ebridge_dim, dbridge_dim,
                memory_hops=2):
    ks = jax.random.split(key, 8)
    s = 0.1
    return {
        "emb":   s * jax.random.normal(ks[0], (vocab, wd_emb_dim), jnp.float32),
        "w_mlp": s * jax.random.normal(ks[1], (kwd_size, wd_emb_dim), jnp.float32),
        "b_mlp": s * jax.random.normal(ks[2], (1, wd_emb_dim), jnp.float32),
        "mkeys": s * jax.random.normal(ks[3], (memory_hops, wd_emb_dim, vocab),
                                       jnp.float32),
        "w_enc": s * jax.random.normal(ks[4], (wd_emb_dim, ebridge_dim), jnp.float32),
        "b_enc": s * jax.random.normal(ks[5], (1, ebridge_dim), jnp.float32),
        "w_dec": s * jax.random.normal(ks[6], (wd_emb_dim, dbridge_dim), jnp.float32),
        "b_dec": s * jax.random.normal(ks[7], (1, dbridge_dim), jnp.float32),
    }


if __name__ == "__main__":
    B, K = 16, 32          # batch, kwd_size
    V, D = 64, 32          # vocab, wd_emb_dim
    E, Dd = 32, 32         # ebridge_dim, dbridge_dim
    HOPS = 2

    key = jax.random.PRNGKey(0)
    k_params, k_logits, k_mask = jax.random.split(key, 3)

    params = init_params(k_params, vocab=V, kwd_size=K, wd_emb_dim=D,
                         ebridge_dim=E, dbridge_dim=Dd, memory_hops=HOPS)
    logits = jax.random.normal(k_logits, (B, K), jnp.float32)
    kwd_mask = (jax.random.uniform(k_mask, (B, K)) > 0.3).astype(jnp.float32)

    e_ref, d_ref = reference_forward(logits, kwd_mask, params)
    e_ref0, d_ref0 = reference_forward(logits, None, params)

    # f32 matmul-operand path (tight check)
    prep_f32 = prepare_memory_bridge(params, compute_dtype=jnp.float32)
    e1, d1 = jax.block_until_ready(memory_bridge_forward(logits, kwd_mask, prep_f32))
    assert e1.shape == (B, E) and d1.shape == (B, Dd)
    assert jnp.allclose(e1, e_ref, rtol=2e-3, atol=2e-3)
    assert jnp.allclose(d1, d_ref, rtol=2e-3, atol=2e-3)

    # default bf16 matmul operands (f32 accumulation / f32 softmax), with mask
    prep = prepare_memory_bridge(params)      # prepared once, reused across calls
    e2, d2 = jax.block_until_ready(memory_bridge_forward(logits, kwd_mask, prep))
    assert jnp.allclose(e2, e_ref, rtol=5e-2, atol=5e-2)
    assert jnp.allclose(d2, d_ref, rtol=5e-2, atol=5e-2)

    # kwd_mask=None branch (no mask tensor is materialized or streamed)
    e3, d3 = jax.block_until_ready(memory_bridge_forward(logits, None, prep))
    assert jnp.allclose(e3, e_ref0, rtol=5e-2, atol=5e-2)
    assert jnp.allclose(d3, d_ref0, rtol=5e-2, atol=5e-2)

    print("KERNEL_OK")
</pallas_src>

<mosaic_0001>
module attributes {stable_mosaic.version = 11 : i64} {
  func.func @kernel(%arg0: i32, %arg1: i32, %arg2: i32, %arg3: memref<16x128xf32, #tpu.memory_space<vmem>>, %arg4: memref<16x128xf32, #tpu.memory_space<vmem>>, %arg5: memref<128x128xf32, #tpu.memory_space<vmem>>, %arg6: memref<1x128xf32, #tpu.memory_space<vmem>>, %arg7: memref<1x128x128xf32, #tpu.memory_space<vmem>>, %arg8: memref<128x128xf32, #tpu.memory_space<vmem>>, %arg9: memref<1x128xf32, #tpu.memory_space<vmem>>, %arg10: memref<128x128xf32, #tpu.memory_space<vmem>>, %arg11: memref<1x128xf32, #tpu.memory_space<vmem>>, %arg12: memref<16x128xf32, #tpu.memory_space<vmem>>, %arg13: memref<16x128xf32, #tpu.memory_space<vmem>>, %arg14: memref<16x128xf32, #tpu.memory_space<vmem>>, %arg15: memref<16x1xf32, #tpu.memory_space<vmem>>, %arg16: memref<16x1xf32, #tpu.memory_space<vmem>>, %arg17: memref<16x128xf32, #tpu.memory_space<vmem>>) attributes {dimension_semantics = [#tpu.dimension_semantics<parallel>, #tpu.dimension_semantics<arbitrary>, #tpu.dimension_semantics<arbitrary>], iteration_bounds = array<i64: 1, 2, 1>, scalar_prefetch = 0 : i64, scratch_operands = 5 : i64, tpu.core_type = #tpu.core_type<tc>, window_params = [{transform_indices = @transform_0, window_bounds = array<i64: 16, 128>}, {transform_indices = @transform_1, window_bounds = array<i64: 16, 128>}, {pipeline_mode = #tpu.pipeline_mode<synchronous>, transform_indices = @transform_2, window_bounds = array<i64: 128, 128>}, {pipeline_mode = #tpu.pipeline_mode<synchronous>, transform_indices = @transform_3, window_bounds = array<i64: 1, 128>}, {transform_indices = @transform_4, window_bounds = array<i64: 1, 128, 128>}, {transform_indices = @transform_5, window_bounds = array<i64: 128, 128>}, {transform_indices = @transform_6, window_bounds = array<i64: 1, 128>}, {pipeline_mode = #tpu.pipeline_mode<synchronous>, transform_indices = @transform_7, window_bounds = array<i64: 128, 128>}, {pipeline_mode = #tpu.pipeline_mode<synchronous>, transform_indices = @transform_8, window_bounds = array<i64: 1, 128>}, {transform_indices = @transform_9, window_bounds = array<i64: 16, 128>}]} {
    %c0_i32 = arith.constant 0 : i32
    %0 = arith.cmpi eq, %arg1, %c0_i32 : i32
    %c0_i32_0 = arith.constant 0 : i32
    %1 = arith.cmpi eq, %arg2, %c0_i32_0 : i32
    %2 = arith.andi %0, %1 : i1
    %3 = arith.extui %2 : i1 to i32
    %c0_i32_1 = arith.constant 0 : i32
    %4 = arith.cmpi ne, %3, %c0_i32_1 : i32
    scf.if %4 {
      %c0_31 = arith.constant 0 : index
      %c0_32 = arith.constant 0 : index
      %46 = vector.load %arg3[%c0_31, %c0_32] : memref<16x128xf32, #tpu.memory_space<vmem>>, vector<16x128xf32>
      %c0_33 = arith.constant 0 : index
      %c0_34 = arith.constant 0 : index
      %47 = vector.load %arg4[%c0_33, %c0_34] : memref<16x128xf32, #tpu.memory_space<vmem>>, vector<16x128xf32>
      %48 = arith.mulf %46, %47 : vector<16x128xf32>
      %c0_35 = arith.constant 0 : index
      %c0_36 = arith.constant 0 : index
      %49 = vector.load %arg5[%c0_35, %c0_36] : memref<128x128xf32, #tpu.memory_space<vmem>>, vector<128x128xf32>
      %cst_37 = arith.constant dense<0.000000e+00> : vector<16x128xf32>
      %50 = tpu.matmul %48, %49, %cst_37 {dimension_numbers = #tpu.dot_dimension_numbers<[1], [0], [0], [1], [0, 0, 1, 1], [], []>} : vector<16x128xf32>, vector<128x128xf32>, vector<16x128xf32> -> vector<16x128xf32>
      %c0_38 = arith.constant 0 : index
      %c0_39 = arith.constant 0 : index
      %51 = vector.load %arg6[%c0_38, %c0_39] : memref<1x128xf32, #tpu.memory_space<vmem>>, vector<1x128xf32>
      %52 = vector.broadcast %51 : vector<1x128xf32> to vector<16x128xf32>
      %53 = arith.addf %50, %52 : vector<16x128xf32>
      %c0_40 = arith.constant 0 : index
      %c0_41 = arith.constant 0 : index
      %54 = vector.load %arg13[%c0_40, %c0_41] : memref<16x128xf32, #tpu.memory_space<vmem>>, vector<16x128xf32>
      tpu.vector_store %arg13[%c0_40, %c0_41], %53 {strides = array<i32>} : memref<16x128xf32, #tpu.memory_space<vmem>>, vector<16x128xf32>,
      %c0_42 = arith.constant 0 : index
      %c0_43 = arith.constant 0 : index
      %55 = vector.load %arg14[%c0_42, %c0_43] : memref<16x128xf32, #tpu.memory_space<vmem>>, vector<16x128xf32>
      tpu.vector_store %arg14[%c0_42, %c0_43], %53 {strides = array<i32>} : memref<16x128xf32, #tpu.memory_space<vmem>>, vector<16x128xf32>,
    } else {
    }
    %c0_i32_2 = arith.constant 0 : i32
    %5 = arith.cmpi eq, %arg2, %c0_i32_2 : i32
    %6 = arith.extui %5 : i1 to i32
    %c0_i32_3 = arith.constant 0 : i32
    %7 = arith.cmpi ne, %6, %c0_i32_3 : i32
    scf.if %7 {
      %cst_31 = arith.constant -1.000000e+30 : f32
      %46 = vector.broadcast %cst_31 : f32 to vector<16x1xf32>
      %c0_32 = arith.constant 0 : index
      %c0_33 = arith.constant 0 : index
      %47 = vector.load %arg15[%c0_32, %c0_33] : memref<16x1xf32, #tpu.memory_space<vmem>>, vector<16x1xf32>
      tpu.vector_store %arg15[%c0_32, %c0_33], %46 {strides = array<i32>} : memref<16x1xf32, #tpu.memory_space<vmem>>, vector<16x1xf32>,
      %cst_34 = arith.constant 0.000000e+00 : f32
      %48 = vector.broadcast %cst_34 : f32 to vector<16x1xf32>
      %c0_35 = arith.constant 0 : index
      %c0_36 = arith.constant 0 : index
      %49 = vector.load %arg16[%c0_35, %c0_36] : memref<16x1xf32, #tpu.memory_space<vmem>>, vector<16x1xf32>
      tpu.vector_store %arg16[%c0_35, %c0_36], %48 {strides = array<i32>} : memref<16x1xf32, #tpu.memory_space<vmem>>, vector<16x1xf32>,
      %cst_37 = arith.constant 0.000000e+00 : f32
      %50 = vector.broadcast %cst_37 : f32 to vector<16x128xf32>
      %c0_38 = arith.constant 0 : index
      %c0_39 = arith.constant 0 : index
      %51 = vector.load %arg17[%c0_38, %c0_39] : memref<16x128xf32, #tpu.memory_space<vmem>>, vector<16x128xf32>
      tpu.vector_store %arg17[%c0_38, %c0_39], %50 {strides = array<i32>} : memref<16x128xf32, #tpu.memory_space<vmem>>, vector<16x128xf32>,
    } else {
    }
    %c0 = arith.constant 0 : index
    %c0_4 = arith.constant 0 : index
    %8 = vector.load %arg14[%c0, %c0_4] : memref<16x128xf32, #tpu.memory_space<vmem>>, vector<16x128xf32>
    %c0_5 = arith.constant 0 : index
    %c0_6 = arith.constant 0 : index
    %c0_7 = arith.constant 0 : index
    %9 = vector.load %arg7[%c0_5, %c0_6, %c0_7] : memref<1x128x128xf32, #tpu.memory_space<vmem>>, vector<1x128x128xf32>
    %10 = vector.shape_cast %9 : vector<1x128x128xf32> to vector<128x128xf32>
    %cst = arith.constant dense<0.000000e+00> : vector<16x128xf32>
    %11 = tpu.matmul %8, %10, %cst {dimension_numbers = #tpu.dot_dimension_numbers<[1], [1], [0], [0], [0, 0, 1, 0], [], []>} : vector<16x128xf32>, vector<128x128xf32>, vector<16x128xf32> -> vector<16x128xf32>
    %c0_8 = arith.constant 0 : index
    %c0_9 = arith.constant 0 : index
    %12 = vector.load %arg9[%c0_8, %c0_9] : memref<1x128xf32, #tpu.memory_space<vmem>>, vector<1x128xf32>
    %13 = vector.broadcast %12 : vector<1x128xf32> to vector<16x128xf32>
    %14 = arith.addf %11, %13 : vector<16x128xf32>
    %c0_10 = arith.constant 0 : index
    %c0_11 = arith.constant 0 : index
    %15 = vector.load %arg15[%c0_10, %c0_11] : memref<16x1xf32, #tpu.memory_space<vmem>>, vector<16x1xf32>
    %cst_12 = arith.constant dense<0xFF800000> : vector<16xf32>
    %16 = vector.multi_reduction <maximumf>, %14, %cst_12 [1] : vector<16x128xf32> to vector<16xf32>
    %17 = vector.shape_cast %16 : vector<16xf32> to vector<16x1xf32>
    %18 = arith.maximumf %15, %17 : vector<16x1xf32>
    %19 = arith.subf %15, %18 : vector<16x1xf32>
    %20 = math.exp %19 : vector<16x1xf32>
    %21 = vector.broadcast %18 : vector<16x1xf32> to vector<16x128xf32>
    %22 = arith.subf %14, %21 : vector<16x128xf32>
    %23 = math.exp %22 : vector<16x128xf32>
    %c0_13 = arith.constant 0 : index
    %c0_14 = arith.constant 0 : index
    %24 = vector.load %arg16[%c0_13, %c0_14] : memref<16x1xf32, #tpu.memory_space<vmem>>, vector<16x1xf32>
    %25 = arith.mulf %20, %24 : vector<16x1xf32>
    %cst_15 = arith.constant dense<0.000000e+00> : vector<16xf32>
    %26 = vector.multi_reduction <add>, %23, %cst_15 [1] : vector<16x128xf32> to vector<16xf32>
    %27 = vector.shape_cast %26 : vector<16xf32> to vector<16x1xf32>
    %28 = arith.addf %25, %27 : vector<16x1xf32>
    %c0_16 = arith.constant 0 : index
    %c0_17 = arith.constant 0 : index
    %29 = vector.load %arg16[%c0_16, %c0_17] : memref<16x1xf32, #tpu.memory_space<vmem>>, vector<16x1xf32>
    tpu.vector_store %arg16[%c0_16, %c0_17], %28 {strides = array<i32>} : memref<16x1xf32, #tpu.memory_space<vmem>>, vector<16x1xf32>,
    %c0_18 = arith.constant 0 : index
    %c0_19 = arith.constant 0 : index
    %30 = vector.load %arg17[%c0_18, %c0_19] : memref<16x128xf32, #tpu.memory_space<vmem>>, vector<16x128xf32>
    %31 = vector.broadcast %20 : vector<16x1xf32> to vector<16x128xf32>
    %32 = arith.mulf %31, %30 : vector<16x128xf32>
    %c0_20 = arith.constant 0 : index
    %c0_21 = arith.constant 0 : index
    %33 = vector.load %arg8[%c0_20, %c0_21] : memref<128x128xf32, #tpu.memory_space<vmem>>, vector<128x128xf32>
    %cst_22 = arith.constant dense<0.000000e+00> : vector<16x128xf32>
    %34 = tpu.matmul %23, %33, %cst_22 {dimension_numbers = #tpu.dot_dimension_numbers<[1], [0], [0], [1], [0, 0, 1, 1], [], []>} : vector<16x128xf32>, vector<128x128xf32>, vector<16x128xf32> -> vector<16x128xf32>
    %35 = arith.addf %32, %34 : vector<16x128xf32>
    %c0_23 = arith.constant 0 : index
    %c0_24 = arith.constant 0 : index
    %36 = vector.load %arg17[%c0_23, %c0_24] : memref<16x128xf32, #tpu.memory_space<vmem>>, vector<16x128xf32>
    tpu.vector_store %arg17[%c0_23, %c0_24], %35 {strides = array<i32>} : memref<16x128xf32, #tpu.memory_space<vmem>>, vector<16x128xf32>,
    %c0_25 = arith.constant 0 : index
    %c0_26 = arith.constant 0 : index
    %37 = vector.load %arg15[%c0_25, %c0_26] : memref<16x1xf32, #tpu.memory_space<vmem>>, vector<16x1xf32>
    tpu.vector_store %arg15[%c0_25, %c0_26], %18 {strides = array<i32>} : memref<16x1xf32, #tpu.memory_space<vmem>>, vector<16x1xf32>,
    %c0_i32_27 = arith.constant 0 : i32
    %38 = arith.cmpi eq, %arg2, %c0_i32_27 : i32
    %39 = arith.extui %38 : i1 to i32
    %c0_i32_28 = arith.constant 0 : i32
    %40 = arith.cmpi ne, %39, %c0_i32_28 : i32
    scf.if %40 {
      %c0_31 = arith.constant 0 : index
      %c0_32 = arith.constant 0 : index
      %46 = vector.load %arg13[%c0_31, %c0_32] : memref<16x128xf32, #tpu.memory_space<vmem>>, vector<16x128xf32>
      %c0_33 = arith.constant 0 : index
      %c0_34 = arith.constant 0 : index
      %47 = vector.load %arg17[%c0_33, %c0_34] : memref<16x128xf32, #tpu.memory_space<vmem>>, vector<16x128xf32>
      %c0_35 = arith.constant 0 : index
      %c0_36 = arith.constant 0 : index
      %48 = vector.load %arg16[%c0_35, %c0_36] : memref<16x1xf32, #tpu.memory_space<vmem>>, vector<16x1xf32>
      %49 = vector.broadcast %48 : vector<16x1xf32> to vector<16x128xf32>
      %50 = arith.divf %47, %49 : vector<16x128xf32>
      %51 = arith.addf %46, %50 : vector<16x128xf32>
      %c0_37 = arith.constant 0 : index
      %c0_38 = arith.constant 0 : index
      %52 = vector.load %arg13[%c0_37, %c0_38] : memref<16x128xf32, #tpu.memory_space<vmem>>, vector<16x128xf32>
      tpu.vector_store %arg13[%c0_37, %c0_38], %51 {strides = array<i32>} : memref<16x128xf32, #tpu.memory_space<vmem>>, vector<16x128xf32>,
      %c0_39 = arith.constant 0 : index
      %c0_40 = arith.constant 0 : index
      %53 = vector.load %arg14[%c0_39, %c0_40] : memref<16x128xf32, #tpu.memory_space<vmem>>, vector<16x128xf32>
      tpu.vector_store %arg14[%c0_39, %c0_40], %51 {strides = array<i32>} : memref<16x128xf32, #tpu.memory_space<vmem>>, vector<16x128xf32>,
    } else {
    }
    %c1_i32 = arith.constant 1 : i32
    %41 = arith.cmpi eq, %arg1, %c1_i32 : i32
    %c0_i32_29 = arith.constant 0 : i32
    %42 = arith.cmpi eq, %arg2, %c0_i32_29 : i32
    %43 = arith.andi %41, %42 : i1
    %44 = arith.extui %43 : i1 to i32
    %c0_i32_30 = arith.constant 0 : i32
    %45 = arith.cmpi ne, %44, %c0_i32_30 : i32
    scf.if %45 {
      %c0_31 = arith.constant 0 : index
      %c0_32 = arith.constant 0 : index
      %46 = vector.load %arg14[%c0_31, %c0_32] : memref<16x128xf32, #tpu.memory_space<vmem>>, vector<16x128xf32>
      %c0_33 = arith.constant 0 : index
      %c0_34 = arith.constant 0 : index
      %47 = vector.load %arg10[%c0_33, %c0_34] : memref<128x128xf32, #tpu.memory_space<vmem>>, vector<128x128xf32>
      %cst_35 = arith.constant dense<0.000000e+00> : vector<16x128xf32>
      %48 = tpu.matmul %46, %47, %cst_35 {dimension_numbers = #tpu.dot_dimension_numbers<[1], [0], [0], [1], [0, 0, 1, 1], [], []>} : vector<16x128xf32>, vector<128x128xf32>, vector<16x128xf32> -> vector<16x128xf32>
      %c0_36 = arith.constant 0 : index
      %c0_37 = arith.constant 0 : index
      %49 = vector.load %arg11[%c0_36, %c0_37] : memref<1x128xf32, #tpu.memory_space<vmem>>, vector<1x128xf32>
      %50 = vector.broadcast %49 : vector<1x128xf32> to vector<16x128xf32>
      %51 = arith.addf %48, %50 : vector<16x128xf32>
      %c0_38 = arith.constant 0 : index
      %c0_39 = arith.constant 0 : index
      %52 = vector.load %arg12[%c0_38, %c0_39] : memref<16x128xf32, #tpu.memory_space<vmem>>, vector<16x128xf32>
      tpu.vector_store %arg12[%c0_38, %c0_39], %51 {strides = array<i32>} : memref<16x128xf32, #tpu.memory_space<vmem>>, vector<16x128xf32>,
    } else {
    }
    return
  }
  func.func @transform_0(%arg0: i32, %arg1: i32, %arg2: i32) -> (i32, i32) {
    %c0_i32 = arith.constant 0 : i32
    %c0_i32_0 = arith.constant 0 : i32
    return %arg0, %c0_i32 : i32, i32
  }
  func.func @transform_1(%arg0: i32, %arg1: i32, %arg2: i32) -> (i32, i32) {
    %c0_i32 = arith.constant 0 : i32
    %c0_i32_0 = arith.constant 0 : i32
    return %arg0, %c0_i32 : i32, i32
  }
  func.func @transform_2(%arg0: i32, %arg1: i32, %arg2: i32) -> (i32, i32) {
    %c0_i32 = arith.constant 0 : i32
    %c0_i32_0 = arith.constant 0 : i32
    %c0_i32_1 = arith.constant 0 : i32
    return %c0_i32, %c0_i32_0 : i32, i32
  }
  func.func @transform_3(%arg0: i32, %arg1: i32, %arg2: i32) -> (i32, i32) {
    %c0_i32 = arith.constant 0 : i32
    %c0_i32_0 = arith.constant 0 : i32
    %c0_i32_1 = arith.constant 0 : i32
    return %c0_i32, %c0_i32_0 : i32, i32
  }
  func.func @transform_4(%arg0: i32, %arg1: i32, %arg2: i32) -> (i32, i32, i32) {
    %c0_i32 = arith.constant 0 : i32
    %c0_i32_0 = arith.constant 0 : i32
    return %arg1, %arg2, %c0_i32 : i32, i32, i32
  }
  func.func @transform_5(%arg0: i32, %arg1: i32, %arg2: i32) -> (i32, i32) {
    %c0_i32 = arith.constant 0 : i32
    %c0_i32_0 = arith.constant 0 : i32
    return %arg2, %c0_i32 : i32, i32
  }
  func.func @transform_6(%arg0: i32, %arg1: i32, %arg2: i32) -> (i32, i32) {
    %c0_i32 = arith.constant 0 : i32
    %c0_i32_0 = arith.constant 0 : i32
    return %c0_i32, %arg2 : i32, i32
  }
  func.func @transform_7(%arg0: i32, %arg1: i32, %arg2: i32) -> (i32, i32) {
    %c0_i32 = arith.constant 0 : i32
    %c0_i32_0 = arith.constant 0 : i32
    %c0_i32_1 = arith.constant 0 : i32
    return %c0_i32, %c0_i32_0 : i32, i32
  }
  func.func @transform_8(%arg0: i32, %arg1: i32, %arg2: i32) -> (i32, i32) {
    %c0_i32 = arith.constant 0 : i32
    %c0_i32_0 = arith.constant 0 : i32
    %c0_i32_1 = arith.constant 0 : i32
    return %c0_i32, %c0_i32_0 : i32, i32
  }
  func.func @transform_9(%arg0: i32, %arg1: i32, %arg2: i32) -> (i32, i32) {
    %c0_i32 = arith.constant 0 : i32
    %c0_i32_0 = arith.constant 0 : i32
    return %arg0, %c0_i32 : i32, i32
  }
}

</mosaic_0001>

<bundles_post_ra>
// kernel: tpu_custom_call.1
= control target key start
LH: loop header
LB: loop body
LE: loop exit
PB: predicated region body
PF: predicated region fallthrough
CT: control target
= control target key end

     0   :  { %s2329_s0 = inlined_call_operand.hbm [shape: f32[16,128], index: 0, kind: input, shape index: {}]   ;;  %s2330_s1 = inlined_call_operand.hbm [shape: f32[16,128], index: 1, kind: input, shape index: {}]   ;;  %s2331_s2 = inlined_call_operand.hbm [shape: f32[128,128], index: 2, kind: input, shape index: {}]   ;;  %s2332_s3 = inlined_call_operand.vmem [shape: f32[1,128], index: 3, kind: input, shape index: {}]   ;;  %s2333_s4 = inlined_call_operand.hbm [shape: f32[2,128,128], index: 4, kind: input, shape index: {}]   ;;  %s2334_s5 = inlined_call_operand.hbm [shape: f32[128,128], index: 5, kind: input, shape index: {}]   ;;  %s2335_s6 = inlined_call_operand.vmem [shape: f32[1,128], index: 6, kind: input, shape index: {}]   ;;  %s2336_s7 = inlined_call_operand.hbm [shape: f32[128,128], index: 7, kind: input, shape index: {}]   ;;  %s2337_s8 = inlined_call_operand.vmem [shape: f32[1,128], index: 8, kind: input, shape index: {}]   ;;  %s2338_s9 = inlined_call_operand.hbm [shape: f32[16,128], index: 9, kind: output, shape index: {}]  }
   0x1   :  { %2344 = sst [smem:[#allocation25_spill]] %s2330_s1 }
   0x2   :  { %2345 = sst [smem:[#allocation26_spill]] %s2337_s8 }
   0x3   :  { %2346 = sst [smem:[#allocation27_spill]] %s2338_s9 }
   0x4   :  { %14 = vsyncpa [#allocation8], 0 }
   0x5   :  { %15 = vsyncpa [#allocation11], 0 }
   0x6   :  { %16 = vsyncpa [#allocation14], 0 }
   0x7   :  { %18 = vsyncpa [#allocation14 + $0x1], 0 }
   0x8   :  { %19 = vsyncpa [#allocation17], 0 }
   0x9   :  { %20 = vsyncpa [#allocation9], 0  ;;  %s1981_s30 = smov 0   ;;  %s1983_s10 = smov 0  }
   0xa   :  { %s1985_s11 = smov 0   ;;  %s1987_s12 = smov 0  }
   0xb   :  { %s1989_s13 = smov 0   ;;  %s1991_s14 = smov 0  }
   0xc LB: > { %s2010_s15 = sadd.s32 4294967295, %s1915_s14   ;;  %p161_p0 = scmp.ne.s32.totalorder %s1899_s10, %s1895_s30  ;;  %s1915_s14 = sphi %s1991_s14, %s26_s14   ;;  %s1911_s13 = sphi %s1989_s13, %s2370_s13   ;;  %s1907_s12 = sphi %s1987_s12, %s2369_s12   ;;  %s1903_s11 = sphi %s1985_s11, %s2368_s11   ;;  %s1899_s10 = sphi %s1983_s10, %s2367_s10   ;;  %s1895_s30 = sphi %s1981_s30, %s2366_s30  }
   0xd   : > { %p2339_p1 = scmp.eq.s32.totalorder %s2010_s15, 0  ;;  %p1145_p2 = scmp.ge.s32.totalorder %s1915_s14, 1 }
   0xe   : > { %p292_p3 = scmp.lt.s32.totalorder %s1915_s14, 3  ;;  %s1917_s18 = smov [#allocation10]  }
   0xf   : > { %p2018_p4 = por %p2339_p1, %p161_p0  ;;  %s323_s19 = sshll.u32 %s1917_s18, 4  ;;  %s324_s19 = int_to_ptr.vmem [resolvable:$true] %s323_s19 }
  0x10   : > { %p2022_p5 = pnand %p1145_p2, %p292_p3  ;;  %s1918_s21 = smov [#allocation15]  }
  0x11   : > { %s2347_s16 = scalar_select %p2018_p4, 1, 0 }
  0x12   : > { %s2348_s17 = scalar_select %p2022_p5, 1, 0 }
  0x13   : > { %p1541_p6 = pneg %p2022_p5  ;;  %s355_s22 = sshll.u32 %s1918_s21, 4  ;;  %s2034_s22 = int_to_ptr.vmem [resolvable:$true] %s355_s22 }
  0x14   : > { %s2350_s1 = sld [smem:[#allocation25_spill]] }
  0x15   : > { %p2030_p7 = pnand %p1541_p6, %p2339_p1 }
  0x17   : > { %p2044_p9 = pneg %p2030_p7 }
  0x1a   : > { %s1649_s25 = scalar_lea.hbm %s2350_s1, 256 }
  0x1b   : > { %p1650_p8 = scmp.ne.s32.totalorder %s2350_s1, %s1649_s25  ;;  %p1656_p12 = scmp.lt.u32.totalorder %s1649_s25, %s2350_s1 }
  0x1d   : > { %p1652_p10 = pnand %p2044_p9, %p1650_p8 }
  0x1f   : > { %p1653_p11 = pneg %p1652_p10 }
  0x21   : > { %p1658_p13 = pnand %p1656_p12, %p1653_p11 }
  0x23   : > { %1661 = shalt.err (!%p1658_p13)
}
  0x24   : > { %s1662_s18 = scalar_lea.vmem %s324_s19, 256  ;;  %p1670_p6 = scmp.lt.s32.totalorder %s324_s19, %s324_s19 }
  0x25   : > { %p1663_p0 = scmp.ne.s32.totalorder %s324_s19, %s1662_s18  ;;  %p1671_p1 = scmp.lt.s32.totalorder %s1662_s18, %s1662_s18 }
  0x27   : > { %p1665_p2 = pnand %p1663_p0, %p2044_p9  ;;  %p1672_p4 = por %p1671_p1, %p1670_p6 }
  0x29   : > { %p1666_p3 = pneg %p1665_p2 }
  0x2b   : > { %p1673_p5 = pnand %p1672_p4, %p1666_p3 }
  0x2d   : > { %1676 = shalt.err (!%p1673_p5)
}
  0x2e   : > { %s2343_s21 = smov 128   ;;  %s1920_s23 = smov 8  }
  0x2f   : > { %1547 = dma.hbm_to_vmem [thread:$0]  (!%p2030_p7), %s2350_s1, 256, %s324_s19, [#allocation11], %s2343_s21, %s2343_s21, %s1920_s23  }
  0x30   : > { %s1677_s29 = scalar_lea.hbm %s2334_s5, 2048 }
  0x31   : > { %p1678_p1 = scmp.ne.s32.totalorder %s2334_s5, %s1677_s29  ;;  %p1684_p8 = scmp.lt.u32.totalorder %s1677_s29, %s2334_s5 }
  0x33   : > { %p1680_p4 = pnand %p1678_p1, %p2044_p9 }
  0x35   : > { %p1681_p5 = pneg %p1680_p4 }
  0x37   : > { %p1686_p10 = pnand %p1684_p8, %p1681_p5 }
  0x39   : > { %1689 = shalt.err (!%p1686_p10)
}
  0x3a   : > { %s1690_s19 = scalar_lea.vmem %s2034_s22, 2048  ;;  %p1698_p0 = scmp.lt.s32.totalorder %s2034_s22, %s2034_s22 }
  0x3b   : > { %p1691_p11 = scmp.ne.s32.totalorder %s2034_s22, %s1690_s19  ;;  %p1699_p2 = scmp.lt.s32.totalorder %s1690_s19, %s1690_s19 }
  0x3d   : > { %p1693_p12 = pnand %p1691_p11, %p2044_p9  ;;  %p1700_p3 = por %p1699_p2, %p1698_p0 }
  0x3f   : > { %p1694_p13 = pneg %p1693_p12 }
  0x41   : > { %p1701_p6 = pnand %p1700_p3, %p1694_p13 }
  0x43   : > { %1704 = shalt.err (!%p1701_p6)
}
  0x44   : > { %1553 = dma.hbm_to_vmem [thread:$0]  (!%p2030_p7), %s2334_s5, 2048, %s2034_s22, [#allocation14], %s2343_s21, %s2343_s21, %s1920_s23  }
  0x45   : > { %s1921_s24 = smov [#allocation7]   ;;  %s1922_s26 = smov [#allocation12]  }
  0x46   : > { %s307_s25 = sshll.u32 %s1921_s24, 4  ;;  %s336_s27 = sshll.u32 %s1922_s26, 4  ;;  %s308_s25 = int_to_ptr.vmem [resolvable:$true] %s307_s25  ;;  %s2089_s27 = int_to_ptr.vmem [resolvable:$true] %s336_s27 }
  0x47   : > { %s1705_s18 = scalar_lea.hbm %s2329_s0, 256 }
  0x48   : > { %p1706_p1 = scmp.ne.s32.totalorder %s2329_s0, %s1705_s18  ;;  %p1712_p8 = scmp.lt.u32.totalorder %s1705_s18, %s2329_s0 }
  0x4a   : > { %p1708_p4 = pnand %p1706_p1, %p2044_p9 }
  0x4c   : > { %p1709_p5 = pneg %p1708_p4 }
  0x4e   : > { %p1714_p10 = pnand %p1712_p8, %p1709_p5 }
  0x50   : > { %1717 = shalt.err (!%p1714_p10)
}
  0x51   : > { %s1718_s9 = scalar_lea.vmem %s308_s25, 256  ;;  %p1726_p0 = scmp.lt.s32.totalorder %s308_s25, %s308_s25 }
  0x52   : > { %p1719_p11 = scmp.ne.s32.totalorder %s308_s25, %s1718_s9  ;;  %p1727_p2 = scmp.lt.s32.totalorder %s1718_s9, %s1718_s9 }
  0x54   : > { %p1721_p12 = pnand %p1719_p11, %p2044_p9  ;;  %p1728_p3 = por %p1727_p2, %p1726_p0 }
  0x56   : > { %p1722_p13 = pneg %p1721_p12 }
  0x58   : > { %p1729_p6 = pnand %p1728_p3, %p1722_p13 }
  0x5a   : > { %1732 = shalt.err (!%p1729_p6)
}
  0x5b   : > { %1544 = dma.hbm_to_vmem [thread:$0]  (!%p2030_p7), %s2329_s0, 256, %s308_s25, [#allocation8], %s2343_s21, %s2343_s21, %s1920_s23  }
  0x5c   : > { %s1733_s30 = scalar_lea.hbm %s2331_s2, 2048 }
  0x5d   : > { %p1734_p1 = scmp.ne.s32.totalorder %s2331_s2, %s1733_s30  ;;  %p1740_p8 = scmp.lt.u32.totalorder %s1733_s30, %s2331_s2 }
  0x5f   : > { %p1736_p4 = pnand %p1734_p1, %p2044_p9 }
  0x61   : > { %p1737_p5 = pneg %p1736_p4 }
  0x63   : > { %p1742_p10 = pnand %p1740_p8, %p1737_p5 }
  0x65   : > { %1745 = shalt.err (!%p1742_p10)
}
  0x66   : > { %s1746_s25 = scalar_lea.vmem %s2089_s27, 2048  ;;  %p1754_p0 = scmp.lt.s32.totalorder %s2089_s27, %s2089_s27 }
  0x67   : > { %p1747_p11 = scmp.ne.s32.totalorder %s2089_s27, %s1746_s25  ;;  %p1755_p2 = scmp.lt.s32.totalorder %s1746_s25, %s1746_s25 }
  0x69   : > { %p1749_p12 = pnand %p1747_p11, %p2044_p9  ;;  %p1756_p3 = por %p1755_p2, %p1754_p0 }
  0x6b   : > { %p1750_p13 = pneg %p1749_p12 }
  0x6d   : > { %p1757_p6 = pnand %p1756_p3, %p1750_p13 }
  0x6f   : > { %1760 = shalt.err (!%p1757_p6)
}
  0x70   : > { %1550 = dma.hbm_to_vmem [thread:$0]  (!%p2030_p7), %s2331_s2, 2048, %s2089_s27, [#allocation11], %s2343_s21, %s2343_s21, %s1920_s23  }
  0x71   : > { %s1923_s24 = smov [#allocation16]   ;;  %s1761_s18 = scalar_lea.hbm %s2336_s7, 2048 }
  0x72   : > { %s374_s26 = sshll.u32 %s1923_s24, 4  ;;  %p1762_p1 = scmp.ne.s32.totalorder %s2336_s7, %s1761_s18  ;;  %s375_s26 = int_to_ptr.vmem [resolvable:$true] %s374_s26 }
  0x73   : > { %p1768_p8 = scmp.lt.u32.totalorder %s1761_s18, %s2336_s7 }
  0x74   : > { %p1764_p4 = pnand %p1762_p1, %p2044_p9 }
  0x76   : > { %p1765_p5 = pneg %p1764_p4 }
  0x78   : > { %p1770_p10 = pnand %p1768_p8, %p1765_p5 }
  0x7a   : > { %1773 = shalt.err (!%p1770_p10)
}
  0x7b   : > { %s1774_s27 = scalar_lea.vmem %s375_s26, 2048  ;;  %p1782_p0 = scmp.lt.s32.totalorder %s375_s26, %s375_s26 }
  0x7c   : > { %p1775_p11 = scmp.ne.s32.totalorder %s375_s26, %s1774_s27  ;;  %p1783_p2 = scmp.lt.s32.totalorder %s1774_s27, %s1774_s27 }
  0x7e   : > { %p1777_p12 = pnand %p1775_p11, %p2044_p9  ;;  %p1784_p3 = por %p1783_p2, %p1782_p0 }
  0x80   : > { %p1778_p13 = pneg %p1777_p12 }
  0x82   : > { %p1785_p6 = pnand %p1784_p3, %p1778_p13 }
  0x84   : > { %1788 = shalt.err (!%p1785_p6)
}
  0x85   : > { %1556 = dma.hbm_to_vmem [thread:$0]  (!%p2030_p7), %s2336_s7, 2048, %s375_s26, [#allocation17], %s2343_s21, %s2343_s21, %s1920_s23  }
  0x86   : > { %s41_s28 = sadd.s32 1, %s1911_s13  ;;  %s148_s20 = sadd.s32 1, %s1903_s11 }
  0x87   : > { %p43_p9 = scmp.ge.s32.totalorder %s41_s28, 2  ;;  %p155_p1 = scmp.ne.s32.totalorder %s1903_s11, %s1899_s10 }
  0x88   : > { %p156_p4 = scmp.eq.s32.totalorder %s1915_s14, 0  ;;  %p1566_p8 = scmp.lt.s32.totalorder %s1915_s14, 2 }
  0x89   : > { %s2372_s28 = smov (%p43_p9, %s41_s28), 0  ;;  %s391_s29 = sand.u32 1, %s1915_s14  }
  0x8a   : > { %p157_p5 = por %p156_p4, %p155_p1  ;;  %s143_s24 = ssub.s32 %s1911_s13, %s2372_s28 }
  0x8b   : > { %p146_p10 = scmp.eq.s32.totalorder %s143_s24, 0  ;;  %s393_s30 = sand.u32 1, %s1903_s11  }
  0x8c   : > { %s1172_s18 = sshll.u32 %s1911_s13, 11  ;;  %s1153_s8 = sshll.u32 %s393_s30, 7 }
  0x8d   : > { %s2173_s19 = scalar_select %p146_p10, %s1903_s11, %s148_s20  }
  0x8e   : > { %s2178_s25 = scalar_lea.hbm %s2333_s4, %s1172_s18  ;;  %p2180_p7 = pnand %p1566_p8, %p157_p5 }
  0x8f   : > { %s395_s9 = scalar_lea.vmem [#allocation13], %s1153_s8  ;;  %s2186_s20 = scalar_lea.sflag [#allocation14], %s391_s29 }
  0x90   : > { %s404_s1 = sshll.u32 %s395_s9, 4  ;;  %s1789_s24 = scalar_lea.hbm %s2178_s25, 2048  ;;  %s2184_s1 = int_to_ptr.vmem [resolvable:$true] %s404_s1 }
  0x91   : > { %p1790_p11 = scmp.ne.s32.totalorder %s2178_s25, %s1789_s24  ;;  %p1791_p12 = pneg %p2180_p7 }
  0x92   : > { %s1794_s22 = scalar_lea.hbm %s2333_s4, 4096  ;;  %p1795_p2 = scmp.lt.u32.totalorder %s2178_s25, %s2333_s4 }
  0x93   : > { %p1792_p13 = pnand %p1791_p12, %p1790_p11  ;;  %p1796_p3 = scmp.lt.u32.totalorder %s1794_s22, %s1789_s24 }
  0x94   : > { %p1798_p9 = scmp.lt.u32.totalorder %s1789_s24, %s2178_s25 }
  0x95   : > { %p1793_p0 = pneg %p1792_p13  ;;  %p1797_p6 = por %p1796_p3, %p1795_p2 }
  0x97   : > { %p1799_p1 = por %p1798_p9, %p1797_p6 }
  0x99   : > { %p1800_p4 = pnand %p1799_p1, %p1793_p0 }
  0x9b   : > { %1803 = shalt.err (!%p1800_p4)
}
  0x9c   : > { %s1804_s29 = scalar_lea.vmem %s2184_s1, 2048  ;;  %s1924_s8 = smov [#allocation13]  }
  0x9d   : > { %p1805_p5 = scmp.ne.s32.totalorder %s2184_s1, %s1804_s29  ;;  %s1809_s9 = sshll.u32 %s1924_s8, 4  ;;  %s1810_s9 = int_to_ptr.vmem [resolvable:$false] %s1809_s9 }
  0x9e   : > { %s1811_s21 = scalar_lea.vmem %s1810_s9, 4096  ;;  %p1812_p11 = scmp.lt.s32.totalorder %s2184_s1, %s1810_s9 }
  0x9f   : > { %p1807_p8 = pnand %p1805_p5, %p1791_p12  ;;  %p1813_p13 = scmp.lt.s32.totalorder %s1811_s21, %s1804_s29 }
  0xa1   : > { %p1808_p10 = pneg %p1807_p8  ;;  %p1814_p2 = por %p1813_p13, %p1812_p11 }
  0xa3   : > { %p1815_p3 = pnand %p1814_p2, %p1808_p10 }
  0xa5   : > { %1818 = shalt.err (!%p1815_p3)
}
  0xa6   : > { %s2353_s24 = smov 128   ;;  %p2354_p12 = scmp.ne.s32.totalorder %s2348_s17, 0 }
  0xa7   : > { %1560 = dma.hbm_to_vmem [thread:$0]  (!%p2180_p7), %s2178_s25, 2048, %s2184_s1, %s2186_s20, %s2353_s24, %s2353_s24, %s1920_s23  }
  0xa8   : > { %416 = sbr.rel (%p2354_p12) target bundleno = 1566 (0x61e), region = 56  ;;  %p2355_p0 = scmp.eq.s32.totalorder (!%p2354_p12), %s2010_s15, 0 }
  0xaf   : > { %1870 = dma.done.wait (%p2355_p0), [#allocation8], 256   ;;  %p2356_p6 = pmov %p2355_p0 }
  0xb0   : > { %p2357_p9 = pmov %p2355_p0 }
  0xb1   : > { %1872 = vsyncadd (%p2356_p6), [#allocation8], 4294967040 }
  0xb2   : > { %1874 = dma.done.wait (%p2357_p9), [#allocation11], 2304   ;;  %p2358_p1 = pmov %p2355_p0 }
  0xb3   : > { %s430_s27 = sand.u32 1, %s2010_s15   ;;  %s432_s23 = sand.u32 1, %s1899_s10  }
  0xb4   : > { %1876 = vsyncadd (%p2358_p1), [#allocation11], 4294964992  ;;  %s1160_s25 = sshll.u32 %s432_s23, 7  ;;  %s431_s17 = scalar_lea.sflag [#allocation14], %s430_s27 }
  0xb5   : > { %s2229_s1 = scalar_lea.vmem [#allocation13], %s1160_s25  ;;  %p2359_p7 = scmp.ne.s32.totalorder %s2347_s16, 0 }
  0xb7   : > { %1878 = dma.done.wait (%p2359_p7), %s431_s17, 2048  }
  0xb8   : > { %1880 = vsyncadd (%p2359_p7), %s431_s17, 4294965248  ;;  %p2360_p4 = pmov %p2355_p0 }
  0xb9   : > { %p2361_p5 = pmov %p2355_p0 }
  0xba   : > { %1882 = dma.done.wait (%p2360_p4), [#allocation14], 2048  }
  0xbb   : > { %1884 = vsyncadd (%p2361_p5), [#allocation14], 4294965248  ;;  %p2362_p8 = pmov %p2355_p0 }
  0xbc   : > { %p2363_p10 = pmov %p2355_p0 }
  0xbd   : > { %1886 = dma.done.wait (%p2362_p8), [#allocation17], 2048  }
  0xbe   : > { %1888 = vsyncadd (%p2363_p10), [#allocation17], 4294965248  ;;  %p483_p11 = scmp.eq.s32.totalorder %s1907_s12, 0 }
  0xbf   : > { %v495_v0 = vld [vmem:[#allocation12] sm:$0xff] (%p483_p11)  ;;  %v496_v1 = vld [vmem:[#allocation12 + $0x8] sm:$0xff] (%p483_p11)  ;;  %v497_v2 = vld [vmem:[#allocation12 + $0x10] sm:$0xff] (%p483_p11) }
  0xc0   : > { %488 = sbr.rel (!%p483_p11) target bundleno = 442 (0x1ba), region = 84  ;;  %v1387_v3 = vpack.c.bf16 (%p483_p11), %v496_v1, %v495_v0  ;;  %v498_v4 = vld [vmem:[#allocation12 + $0x18] sm:$0xff] (%p483_p11)  ;;  %v499_v6 = vld [vmem:[#allocation12 + $0x20] sm:$0xff] (%p483_p11)  ;;  %v500_v7 = vld [vmem:[#allocation12 + $0x28] sm:$0xff] (%p483_p11) }
  0xc1   : > { %v1391_v5 = vpack.c.bf16 (%p483_p11), %v498_v4, %v497_v2  ;;  %v1395_v8 = vpack.c.bf16 (%p483_p11), %v500_v7, %v499_v6  ;;  %v489_v9 = vld [vmem:[#allocation7] sm:$0xff] (%p483_p11)  ;;  %v491_v10 = vld [vmem:[#allocation10] sm:$0xff] (%p483_p11)  ;;  %v502_v12 = vld [vmem:[#allocation12 + $0x38] sm:$0xff] (%p483_p11) }
  0xc2   : > { %1388 = vmatprep.subr.bf16.mxu0 (%p483_p11), %v1387_v3  ;;  %v501_v11 = vld [vmem:[#allocation12 + $0x30] sm:$0xff] (%p483_p11)  ;;  %v493_v13 = vmul.f32 (%p483_p11), %v491_v10, %v489_v9  ;;  %v503_v15 = vld [vmem:[#allocation12 + $0x40] sm:$0xff] (%p483_p11)  ;;  %v504_v16 = vld [vmem:[#allocation12 + $0x48] sm:$0xff] (%p483_p11) }
  0xc3   : > { %1390 = vmatpush3.bf16.msra.mxu0 (%p483_p11), %v1387_v3  ;;  %v1399_v14 = vpack.c.bf16 (%p483_p11), %v502_v12, %v501_v11  ;;  %v1403_v17 = vpack.c.bf16 (%p483_p11), %v504_v16, %v503_v15  ;;  %v505_v18 = vld [vmem:[#allocation12 + $0x50] sm:$0xff] (%p483_p11)  ;;  %v506_v19 = vld [vmem:[#allocation12 + $0x58] sm:$0xff] (%p483_p11)  ;;  %v507_v21 = vld [vmem:[#allocation12 + $0x60] sm:$0xff] (%p483_p11) }
  0xc4   : > { %1392 = vmatprep.subr.bf16.mxu0 (%p483_p11), %v1391_v5  ;;  %1279 = vmatprep.mubr.f32.mxu0 (%p483_p11), %v493_v13  ;;  %v1407_v20 = vpack.c.bf16 (%p483_p11), %v506_v19, %v505_v18  ;;  %v508_v22 = vld [vmem:[#allocation12 + $0x68] sm:$0xff] (%p483_p11)  ;;  %v509_v24 = vld [vmem:[#allocation12 + $0x70] sm:$0xff] (%p483_p11)  ;;  %v510_v25 = vld [vmem:[#allocation12 + $0x78] sm:$0xff] (%p483_p11) }
  0xc5   : > { %v1411_v23 = vpack.c.bf16 (%p483_p11), %v508_v22, %v507_v21  ;;  %v1415_v26 = vpack.c.bf16 (%p483_p11), %v510_v25, %v509_v24  ;;  %v490_v27 = vld [vmem:[#allocation7 + $0x8] sm:$0xff] (%p483_p11)  ;;  %v492_v28 = vld [vmem:[#allocation10 + $0x8] sm:$0xff] (%p483_p11)  ;;  %v1164_v30 = vld [vmem:[%s2332_s3] ss:$0 sm:$0xff] (%p483_p11) }
  0xc6   : > { %v494_v29 = vmul.f32 (%p483_p11), %v492_v28, %v490_v27 }
  0xc7   : > { %1394 = vmatpush3.bf16.msra.mxu0 %v1391_v5 }
  0xc8   : > { %1396 = vmatprep.subr.bf16.mxu0 %v1395_v8 }
  0xcb   : > { %1398 = vmatpush3.bf16.msra.mxu0 %v1395_v8 }
  0xcc   : > { %1400 = vmatprep.subr.bf16.mxu0 %v1399_v14 }
  0xcf   : > { %1402 = vmatpush3.bf16.msra.mxu0 %v1399_v14 }
  0xd0   : > { %1404 = vmatprep.subr.bf16.mxu0 %v1403_v17 }
  0xd3   : > { %1406 = vmatpush3.bf16.msra.mxu0 %v1403_v17 }
  0xd4   : > { %1408 = vmatprep.subr.bf16.mxu0 %v1407_v20 }
  0xd7   : > { %1410 = vmatpush3.bf16.msra.mxu0 %v1407_v20 }
  0xd8   : > { %1412 = vmatprep.subr.bf16.mxu0 %v1411_v23 }
  0xdb   : > { %1414 = vmatpush3.bf16.msra.mxu0 %v1411_v23 }
  0xdc   : > { %1416 = vmatprep.subr.bf16.mxu0 %v1415_v26 }
  0xdf   : > { %1418 = vmatpush3.bf16.msra.mxu0 %v1415_v26 }
  0xe2   : > { %1280 = vmatmul.mubr.f32.vlgmr.msra.gmra.mrb[0].mxu0 %v494_v29 }
 0x1b5   : > { %v1281_v31 = vpop.f32.mrb[0].mxu0 }
 0x1b6   : > { %v590_v32 = vadd.f32 %v1281_v31, %v1164_v30  ;;  %v584_v33 = vpop.f32.mrb[1].mxu0 }
 0x1b7   : > { %v585_v34 = vadd.f32 %v1164_v30, %v584_v33 }
 0x1b8   : > { %594 = vst [vmem:[#allocation2 + $0x8] sm:$0xff] %v590_v32  ;;  %596 = vst [vmem:[#allocation3 + $0x8] sm:$0xff] %v590_v32 }
 0x1b9   : > { %593 = vst [vmem:[#allocation2] sm:$0xff] %v585_v34  ;;  %595 = vst [vmem:[#allocation3] sm:$0xff] %v585_v34 }
 0x1ba PF: > { %v609_v35 = vld [vmem:[%s2229_s1] sm:$0xff]  ;;  %v610_v36 = vld [vmem:[%s2229_s1 + $0x8] sm:$0xff]  ;;  %v611_v37 = vld [vmem:[%s2229_s1 + $0x10] sm:$0xff]  ;;  %vm600_vm0 = vcmask 7168   ;;  %v1925_v2 = vmov -1e+30  }
 0x1bb   : > { %v1419_v38 = vpack.c.bf16 %v610_v36, %v609_v35  ;;  %v612_v39 = vld [vmem:[%s2229_s1 + $0x18] sm:$0xff]  ;;  %v613_v42 = vld [vmem:[%s2229_s1 + $0x20] sm:$0xff]  ;;  %v614_v43 = vld [vmem:[%s2229_s1 + $0x28] sm:$0xff]  ;;  %601 = vst.msk [vmem:[#allocation4] sm:$0xff] %vm600_vm0, %v1925_v2  ;;  %v1926_v3 = vmov 0   ;;  %v1927_v4 = vmov 0.0  }
 0x1bc   : > { %v1423_v40 = vpack.c.bf16 %v612_v39, %v611_v37  ;;  %v1427_v44 = vpack.c.bf16 %v614_v43, %v613_v42  ;;  %v615_v45 = vld [vmem:[%s2229_s1 + $0x30] sm:$0xff]  ;;  %v616_v46 = vld [vmem:[%s2229_s1 + $0x38] sm:$0xff]  ;;  %v617_v48 = vld [vmem:[%s2229_s1 + $0x40] sm:$0xff]  ;;  %602 = vst.msk [vmem:[#allocation4 + $0x8] sm:$0xff] %vm600_vm0, %v1925_v2  ;;  %1635 = vset.pattern.permute.xlu1 %v1926_v3  ;;  %1636 = vset.pattern.permute.xlu0 %v1926_v3  ;;  %p890_p13 = scmp.eq.s32.totalorder %s1907_s12, 1 }
 0x1bd   : > { %1420 = vmatprep.subr.bf16.mxu0 %v1419_v38  ;;  %v1431_v47 = vpack.c.bf16 %v616_v46, %v615_v45  ;;  %v618_v49 = vld [vmem:[%s2229_s1 + $0x48] sm:$0xff]  ;;  %v619_v51 = vld [vmem:[%s2229_s1 + $0x50] sm:$0xff]  ;;  %v620_v52 = vld [vmem:[%s2229_s1 + $0x58] sm:$0xff]  ;;  %603 = vst.msk [vmem:[#allocation5] sm:$0xff] %vm600_vm0, %v1927_v4  ;;  %s2364_s26 = sld [smem:[#allocation26_spill]] (%p890_p13) }
 0x1be   : > { %1422 = vmatpush3.bf16.xpose.msra.mxu0 %v1419_v38  ;;  %v1435_v50 = vpack.c.bf16 %v618_v49, %v617_v48  ;;  %v1439_v53 = vpack.c.bf16 %v620_v52, %v619_v51  ;;  %v621_v54 = vld [vmem:[%s2229_s1 + $0x60] sm:$0xff]  ;;  %v622_v55 = vld [vmem:[%s2229_s1 + $0x68] sm:$0xff]  ;;  %v623_v57 = vld [vmem:[%s2229_s1 + $0x70] sm:$0xff]  ;;  %604 = vst.msk [vmem:[#allocation5 + $0x8] sm:$0xff] %vm600_vm0, %v1927_v4 }
 0x1bf   : > { %1424 = vmatprep.subr.bf16.mxu0 %v1423_v40  ;;  %v1443_v56 = vpack.c.bf16 %v622_v55, %v621_v54  ;;  %v624_v58 = vld [vmem:[%s2229_s1 + $0x78] sm:$0xff]  ;;  %v1165_v61 = vld [vmem:[%s2335_s6] ss:$0 sm:$0xff]  ;;  %v765_v6 = vld [vmem:[#allocation15 + $0x8] sm:$0xff] }
 0x1c0   : > { %v607_v41 = vld [vmem:[#allocation3] sm:$0xff]  ;;  %v1447_v59 = vpack.c.bf16 %v624_v58, %v623_v57  ;;  %v608_v60 = vld [vmem:[#allocation3 + $0x8] sm:$0xff]  ;;  %v764_v5 = vld [vmem:[#allocation15] sm:$0xff] }
 0x1c1   : > { %1314 = vmatprep.mubr.f32.mxu0 %v607_v41  ;;  %v766_v7 = vld [vmem:[#allocation15 + $0x10] sm:$0xff]  ;;  %v1451_v8 = vpack.c.bf16 %v765_v6, %v764_v5  ;;  %v767_v9 = vld [vmem:[#allocation15 + $0x18] sm:$0xff]  ;;  %v768_v11 = vld [vmem:[#allocation15 + $0x20] sm:$0xff] }
 0x1c2   : > { %v1455_v10 = vpack.c.bf16 %v767_v9, %v766_v7  ;;  %v769_v12 = vld [vmem:[#allocation15 + $0x28] sm:$0xff]  ;;  %v770_v14 = vld [vmem:[#allocation15 + $0x30] sm:$0xff]  ;;  %v771_v15 = vld [vmem:[#allocation15 + $0x38] sm:$0xff] }
 0x1c3   : > { %1452 = vmatprep.subr.bf16.mxu1 %v1451_v8  ;;  %v1459_v13 = vpack.c.bf16 %v769_v12, %v768_v11  ;;  %v1463_v16 = vpack.c.bf16 %v771_v15, %v770_v14  ;;  %v707_v17 = vld [vmem:[#allocation4] sm:$0xff]  ;;  %v708_v20 = vld [vmem:[#allocation4 + $0x8] sm:$0xff]  ;;  %v774_v28 = vld [vmem:[#allocation15 + $0x50] sm:$0xff] }
 0x1c4   : > { %1454 = vmatpush3.bf16.msra.mxu1 %v1451_v8  ;;  %v772_v22 = vld [vmem:[#allocation15 + $0x40] sm:$0xff]  ;;  %v773_v23 = vld [vmem:[#allocation15 + $0x48] sm:$0xff]  ;;  %v775_v29 = vld [vmem:[#allocation15 + $0x58] sm:$0xff] }
 0x1c5   : > { %1456 = vmatprep.subr.bf16.mxu1 %v1455_v10  ;;  %v1467_v25 = vpack.c.bf16 %v773_v23, %v772_v22  ;;  %v1471_v30 = vpack.c.bf16 %v775_v29, %v774_v28  ;;  %v776_v31 = vld [vmem:[#allocation15 + $0x60] sm:$0xff]  ;;  %v777_v32 = vld [vmem:[#allocation15 + $0x68] sm:$0xff]  ;;  %v778_v33 = vld [vmem:[#allocation15 + $0x70] sm:$0xff] }
 0x1c6   : > { %1426 = vmatpush3.bf16.xpose.msra.mxu0 %v1423_v40  ;;  %v1475_v34 = vpack.c.bf16 %v777_v32, %v776_v31  ;;  %v779_v35 = vld [vmem:[#allocation15 + $0x78] sm:$0xff]  ;;  %v737_v48 = vld [vmem:[#allocation5] sm:$0xff]  ;;  %v864_v5 = vld [vmem:[#allocation2] sm:$0xff] }
 0x1c7   : > { %1428 = vmatprep.subr.bf16.mxu0 %v1427_v44  ;;  %v1479_v36 = vpack.c.bf16 %v779_v35, %v778_v33  ;;  %v738_v52 = vld [vmem:[#allocation5 + $0x8] sm:$0xff]  ;;  %v898_v14 = vld [vmem:[#allocation16 + $0x8] sm:$0xff] (%p890_p13)  ;;  %v899_v15 = vld [vmem:[#allocation16 + $0x10] sm:$0xff] (%p890_p13) }
 0x1c8   : > { %1458 = vmatpush3.bf16.msra.mxu1 %v1455_v10  ;;  %v865_v10 = vld [vmem:[#allocation2 + $0x8] sm:$0xff]  ;;  %v903_v23 = vld [vmem:[#allocation16 + $0x30] sm:$0xff] (%p890_p13)  ;;  %v909_v32 = vld [vmem:[#allocation16 + $0x60] sm:$0xff] (%p890_p13) }
 0x1c9   : > { %1460 = vmatprep.subr.bf16.mxu1 %v1459_v13  ;;  %v907_v29 = vld [vmem:[#allocation16 + $0x50] sm:$0xff] (%p890_p13)  ;;  %v910_v33 = vld [vmem:[#allocation16 + $0x68] sm:$0xff] (%p890_p13) }
 0x1ca   : > { %v911_v35 = vld [vmem:[#allocation16 + $0x70] sm:$0xff] (%p890_p13) }
 0x1cc   : > { %1462 = vmatpush3.bf16.msra.mxu1 %v1459_v13  ;;  %v897_v13 = vld [vmem:[#allocation16] sm:$0xff] (%p890_p13) }
 0x1cd   : > { %1464 = vmatprep.subr.bf16.mxu1 %v1463_v16 }
 0x1ce   : > { %1430 = vmatpush3.bf16.xpose.msra.mxu0 %v1427_v44 }
 0x1cf   : > { %1432 = vmatprep.subr.bf16.mxu0 %v1431_v47 }
 0x1d0   : > { %1466 = vmatpush3.bf16.msra.mxu1 %v1463_v16  ;;  %v1483_v16 = vpack.c.bf16 (%p890_p13), %v898_v14, %v897_v13 }
 0x1d1   : > { %1468 = vmatprep.subr.bf16.mxu1 %v1467_v25 }
 0x1d4   : > { %1470 = vmatpush3.bf16.msra.mxu1 %v1467_v25 }
 0x1d5   : > { %1472 = vmatprep.subr.bf16.mxu1 %v1471_v30 }
 0x1d6   : > { %1434 = vmatpush3.bf16.xpose.msra.mxu0 %v1431_v47 }
 0x1d7   : > { %1436 = vmatprep.subr.bf16.mxu0 %v1435_v50 }
 0x1d8   : > { %1474 = vmatpush3.bf16.msra.mxu1 %v1471_v30  ;;  %v908_v30 = vld [vmem:[#allocation16 + $0x58] sm:$0xff] (%p890_p13) }
 0x1d9   : > { %1476 = vmatprep.subr.bf16.mxu1 %v1475_v34  ;;  %v1503_v31 = vpack.c.bf16 (%p890_p13), %v908_v30, %v907_v29 }
 0x1dc   : > { %1478 = vmatpush3.bf16.msra.mxu1 %v1475_v34  ;;  %v1507_v34 = vpack.c.bf16 (%p890_p13), %v910_v33, %v909_v32 }
 0x1dd   : > { %1480 = vmatprep.subr.bf16.mxu1 %v1479_v36 }
 0x1de   : > { %1438 = vmatpush3.bf16.xpose.msra.mxu0 %v1435_v50 }
 0x1df   : > { %1440 = vmatprep.subr.bf16.mxu0 %v1439_v53 }
 0x1e0   : > { %1482 = vmatpush3.bf16.msra.mxu1 %v1479_v36  ;;  %v912_v36 = vld [vmem:[#allocation16 + $0x78] sm:$0xff] (%p890_p13) }
 0x1e6   : > { %1442 = vmatpush3.bf16.xpose.msra.mxu0 %v1439_v53 }
 0x1e7   : > { %1444 = vmatprep.subr.bf16.mxu0 %v1443_v56 }
 0x1ee   : > { %1446 = vmatpush3.bf16.xpose.msra.mxu0 %v1443_v56 }
 0x1ef   : > { %1448 = vmatprep.subr.bf16.mxu0 %v1447_v59 }
 0x1f6   : > { %1450 = vmatpush3.bf16.xpose.msra.mxu0 %v1447_v59 }
 0x1f7   : > { %1484 = vmatprep.subr.bf16.mxu0 (%p890_p13), %v1483_v16 }
 0x1fd   : > { %1315 = vmatmul.mubr.f32.vlgmr.msra.gmra.mrb[0].mxu0 %v608_v60 }
 0x1fe   : > { %1486 = vmatpush3.bf16.msra.mxu0 (%p890_p13), %v1483_v16 }
 0x2d0   : > { %v1316_v62 = vpop.f32.mrb[0].mxu0 }
 0x2d1   : > { %v698_v63 = vpop.f32.mrb[1].mxu0  ;;  %v2269_v1 = vadd.f32 %v1316_v62, %v1165_v61 }
 0x2d2   : > { %v2266_v0 = vadd.f32 %v1165_v61, %v698_v63 }
 0x2d4   : > { %709 = vmax.xlane.f32.xlu0 %v2266_v0 }
 0x2d8   : > { %711 = vmax.xlane.f32.xlu0 %v2269_v1 }
 0x361   : > { %v710_v18 = vpop.xlane.xlu0 %709 }
 0x362   : > { %v713_v19 = vmax.f32 %v707_v17, %v710_v18 }
 0x364   : > { %v715_v21 = vsub.f32 %v707_v17, %v713_v19  ;;  %859 = vst.msk [vmem:[#allocation4] sm:$0xff] %vm600_vm0, %v713_v19  ;;  %723 = vperm.xlu1 %1635, %v713_v19   ;;  %v900_v17 = vld [vmem:[#allocation16 + $0x18] sm:$0xff] (%p890_p13)  ;;  %v901_v19 = vld [vmem:[#allocation16 + $0x20] sm:$0xff] (%p890_p13) }
 0x365   : > { %v712_v24 = vpop.xlane.xlu0 %711  ;;  %v1487_v18 = vpack.c.bf16 (%p890_p13), %v900_v17, %v899_v15 }
 0x366   : > { %v714_v26 = vmax.f32 %v708_v20, %v712_v24  ;;  %v717_v45 = vmul.f32 1.442695, %v715_v21  ;;  %v904_v24 = vld [vmem:[#allocation16 + $0x38] sm:$0xff] (%p890_p13) }
 0x367   : > { %1488 = vmatprep.subr.bf16.mxu0 (%p890_p13), %v1487_v18  ;;  %v1495_v25 = vpack.c.bf16 (%p890_p13), %v904_v24, %v903_v23 }
 0x368   : > { %v716_v27 = vsub.f32 %v708_v20, %v714_v26  ;;  %860 = vst.msk [vmem:[#allocation4 + $0x8] sm:$0xff] %vm600_vm0, %v714_v26  ;;  %728 = vperm.xlu1 %1635, %v714_v26   ;;  %v902_v20 = vld [vmem:[#allocation16 + $0x28] sm:$0xff] (%p890_p13)  ;;  %1490 = vmatpush3.bf16.msra.mxu0 (%p890_p13), %v1487_v18  ;;  %v905_v26 = vld [vmem:[#allocation16 + $0x40] sm:$0xff] (%p890_p13) }
 0x369   : > { %v1491_v21 = vpack.c.bf16 (%p890_p13), %v902_v20, %v901_v19 }
 0x36a   : > { %v719_v46 = vmul.f32 1.442695, %v716_v27  ;;  %v906_v27 = vld [vmem:[#allocation16 + $0x48] sm:$0xff] (%p890_p13) }
 0x36b   : > { %1492 = vmatprep.subr.bf16.mxu0 (%p890_p13), %v1491_v21  ;;  %v1499_v28 = vpack.c.bf16 (%p890_p13), %v906_v27, %v905_v26 }
 0x36c   : > { %1494 = vmatpush3.bf16.msra.mxu0 (%p890_p13), %v1491_v21 }
 0x36d   : > { %1496 = vmatprep.subr.bf16.mxu0 (%p890_p13), %v1495_v25 }
 0x370   : > { %1498 = vmatpush3.bf16.msra.mxu0 (%p890_p13), %v1495_v25 }
 0x371   : > { %1500 = vmatprep.subr.bf16.mxu0 (%p890_p13), %v1499_v28 }
 0x374   : > { %1502 = vmatpush3.bf16.msra.mxu0 (%p890_p13), %v1499_v28 }
 0x375   : > { %1504 = vmatprep.subr.bf16.mxu0 (%p890_p13), %v1503_v31 }
 0x378   : > { %1506 = vmatpush3.bf16.msra.mxu0 (%p890_p13), %v1503_v31 }
 0x379   : > { %1508 = vmatprep.subr.bf16.mxu0 (%p890_p13), %v1507_v34 }
 0x37c   : > { %1510 = vmatpush3.bf16.msra.mxu0 (%p890_p13), %v1507_v34 }
 0x3e3   : > { %v724_v37 = vpop.permute.xlu1 %723 }
 0x3e4   : > { %v731_v38 = vsub.f32 %v2266_v0, %v724_v37  ;;  %v1511_v37 = vpack.c.bf16 (%p890_p13), %v912_v36, %v911_v35 }
 0x3e6   : > { %v733_v39 = vmul.f32 1.442695, %v731_v38  ;;  %1512 = vmatprep.subr.bf16.mxu0 (%p890_p13), %v1511_v37 }
 0x3e7   : > { %v729_v40 = vpop.permute.xlu1 %728  ;;  %1514 = vmatpush3.bf16.msra.mxu0 (%p890_p13), %v1511_v37 }
 0x3e8   : > { %1637 = vpow2.f32 %v733_v39  ;;  %v732_v41 = vsub.f32 %v2269_v1, %v729_v40  ;;  %v1167_v39 = vld [vmem:[%s2364_s26] ss:$0 sm:$0xff] (%p890_p13) }
 0x3ea   : > { %v735_v42 = vmul.f32 1.442695, %v732_v41 }
 0x3ec   : > { %1639 = vpow2.f32 %v735_v42 }
 0x3ed   : > { %1641 = vpow2.f32 %v717_v45 }
 0x3ee   : > { %1643 = vpow2.f32 %v719_v46 }
 0x3f2   : > { %v1638_v43 = vpop.eup %1637 }
 0x3f3   : > { %741 = vadd.xlane.f32.xlu0 %v1638_v43  ;;  %1349 = vmatprep.mubr.f32.mxu1 %v1638_v43 }
 0x3f6   : > { %v1640_v44 = vpop.eup %1639 }
 0x3f7   : > { %743 = vadd.xlane.f32.xlu1 %v1640_v44  ;;  %1350 = vmatmul.mubr.f32.vlgmr.msra.gmra.mrb[0].mxu1 %v1640_v44  ;;  %v1642_v47 = vpop.eup %1641 }
 0x3f8   : > { %v739_v49 = vmul.f32 %v1642_v47, %v737_v48  ;;  %v1644_v50 = vpop.eup %1643 }
 0x3f9   : > { %v740_v54 = vmul.f32 %v1644_v50, %v738_v52 }
 0x480   : > { %v742_v51 = vpop.xlane.xlu0 %741 }
 0x481   : > { %v745_v53 = vadd.f32 %v742_v51, %v739_v49 }
 0x483   : > { %748 = vst.msk [vmem:[#allocation5] sm:$0xff] %vm600_vm0, %v745_v53 }
 0x484   : > { %v744_v55 = vpop.xlane.xlu1 %743 }
 0x485   : > { %v746_v56 = vadd.f32 %v744_v55, %v740_v54 }
 0x487   : > { %749 = vst.msk [vmem:[#allocation5 + $0x8] sm:$0xff] %vm600_vm0, %v746_v56 }
 0x48a   : > { %v868_v57 = vld [vmem:[#allocation5] sm:$0xff] }
 0x48b   : > { %872 = vperm.xlu0 %1636, %v868_v57  }
 0x48e   : > { %v869_v58 = vld [vmem:[#allocation5 + $0x8] sm:$0xff] }
 0x48f   : > { %877 = vperm.xlu1 %1635, %v869_v58   ;;  %754 = vperm.xlu0 %1636, %v1642_v47  }
 0x493   : > { %759 = vperm.xlu0 %1636, %v1644_v50  }
 0x4ca   : > { %v1351_v59 = vpop.f32.mrb[0].mxu1 }
 0x4cb   : > { %v846_v60 = vpop.f32.mrb[1].mxu1 }
 0x50a   : > { %v873_v61 = vpop.permute.xlu0 %872 }
 0x50b   : > { %1645 = vrcp.f32 %v873_v61 }
 0x50e   : > { %v878_v62 = vpop.permute.xlu1 %877  ;;  %v755_v63 = vpop.permute.xlu0 %754 }
 0x50f   : > { %1647 = vrcp.f32 %v878_v62  ;;  %v762_v0 = vmul.f32 0.0, %v755_v63 }
 0x511   : > { %v855_v2 = vadd.f32 %v846_v60, %v762_v0 }
 0x512   : > { %v760_v1 = vpop.permute.xlu0 %759 }
 0x513   : > { %v763_v3 = vmul.f32 0.0, %v760_v1 }
 0x515   : > { %v1646_v4 = vpop.eup %1645  ;;  %v856_v8 = vadd.f32 %v1351_v59, %v763_v3 }
 0x516   : > { %v881_v6 = vmul.f32 %v1646_v4, %v855_v2 }
 0x518   : > { %v884_v7 = vadd.f32 %v881_v6, %v864_v5  ;;  %894 = sbr.rel (!%p890_p13) target bundleno = 1534 (0x5fe), region = 96 }
 0x519   : > { %v1648_v9 = vpop.eup %1647 }
 0x51a   : > { %886 = vst [vmem:[#allocation2] sm:$0xff] %v884_v7  ;;  %888 = vst [vmem:[#allocation3] sm:$0xff] %v884_v7  ;;  %v883_v11 = vmul.f32 %v1648_v9, %v856_v8 }
 0x51c   : > { %v885_v12 = vadd.f32 %v883_v11, %v865_v10 }
 0x51e   : > { %887 = vst [vmem:[#allocation2 + $0x8] sm:$0xff] %v885_v12  ;;  %889 = vst [vmem:[#allocation3 + $0x8] sm:$0xff] %v885_v12 }
 0x521   : > { %v895_v22 = vld [vmem:[#allocation3] sm:$0xff] }
 0x522   : > { %1384 = vmatprep.mubr.f32.mxu0 %v895_v22 }
 0x525   : > { %v896_v38 = vld [vmem:[#allocation3 + $0x8] sm:$0xff] }
 0x526   : > { %1385 = vmatmul.mubr.f32.vlgmr.msra.gmra.mrb[0].mxu0 %v896_v38 }
 0x5f9   : > { %v1386_v40 = vpop.f32.mrb[0].mxu0 }
 0x5fa   : > { %v992_v41 = vadd.f32 %v1386_v40, %v1167_v39  ;;  %v986_v42 = vpop.f32.mrb[1].mxu0 }
 0x5fb   : > { %v987_v43 = vadd.f32 %v1167_v39, %v986_v42 }
 0x5fc   : > { %996 = vst [vmem:[#allocation18 + $0x8] sm:$0xff] %v992_v41 }
 0x5fd   : > { %995 = vst [vmem:[#allocation18] sm:$0xff] %v987_v43 }
 0x5fe PF: > { %p1572_p2 = scmp.eq.s32.totalorder %s2010_s15, 1  ;;  %s1928_s29 = smov [#allocation18]  }
 0x5ff   : > { %s1006_s8 = sshll.u32 %s1928_s29, 4  ;;  %s1007_s8 = int_to_ptr.vmem [resolvable:$true] %s1006_s8 }
 0x600   : > { %s1819_s9 = scalar_lea.vmem %s1007_s8, 256  ;;  %p1826_p6 = scmp.lt.s32.totalorder %s1007_s8, %s1007_s8 }
 0x601   : > { %p1820_p3 = scmp.ne.s32.totalorder %s1007_s8, %s1819_s9  ;;  %p1827_p9 = scmp.lt.s32.totalorder %s1819_s9, %s1819_s9 }
 0x603   : > { %p1821_p12 = pnand %p1820_p3, %p1572_p2  ;;  %p1828_p1 = por %p1827_p9, %p1826_p6 }
 0x605   : > { %p1822_p0 = pneg %p1821_p12 }
 0x607   : > { %p1829_p7 = pnand %p1828_p1, %p1822_p0 }
 0x609   : > { %1832 = shalt.err (!%p1829_p7)
}
 0x60a   : > { %s2365_s27 = sld [smem:[#allocation27_spill]] }
 0x610   : > { %s1833_s23 = scalar_lea.hbm %s2365_s27, 256 }
 0x611   : > { %p1834_p4 = scmp.ne.s32.totalorder %s2365_s27, %s1833_s23  ;;  %p1839_p10 = scmp.lt.u32.totalorder %s1833_s23, %s2365_s27 }
 0x613   : > { %p1835_p5 = pnand %p1834_p4, %p1572_p2 }
 0x615   : > { %p1836_p8 = pneg %p1835_p5 }
 0x617   : > { %p1841_p11 = pnand %p1839_p10, %p1836_p8 }
 0x619   : > { %1844 = shalt.err (!%p1841_p11)
}
 0x61a   : > { %s1929_s20 = smov 128   ;;  %s1930_s30 = smov 8  }
 0x61b   : > { %1538 = dma.vmem_to_hbm [thread:$0]  (%p1572_p2), %s1007_s8, 256, %s2365_s27, [#allocation9], %s1929_s20, %s1929_s20, %s1930_s30  }
 0x61c   : > { %1890 = dma.done.wait (%p1572_p2), [#allocation9], 256  }
 0x61d   : > { %1892 = vsyncadd (%p1572_p2), [#allocation9], 4294967040 }
 0x61e PF: > { %s26_s14 = sadd.s32 1, %s1915_s14   ;;  %s2366_s30 = smov %s1899_s10 }
 0x61f   : > { %p23_p13 = scmp.ge.s32.totalorder %s26_s14, 4   ;;  %s2367_s10 = smov %s1903_s11 }
 0x620   : > { %s2368_s11 = smov %s2173_s19  ;;  %s2369_s12 = smov %s1911_s13 }
 0x621   : > { %s2370_s13 = smov %s2372_s28  ;;  %25 = sbr.rel (!%p23_p13) target bundleno = 12 (0xc), region = 137 }
 0x628   :  { %1022 = vsyncpa [#allocation8], 1 }
 0x629   :  { %1024 = vsyncpa [#allocation8 + $0x1], 1 }
 0x62a   :  { %1025 = vsyncpa [#allocation11], 1 }
 0x62b   :  { %1026 = vsyncpa [#allocation14], 1 }
 0x62c   :  { %1028 = vsyncpa [#allocation14 + $0x1], 1 }
 0x62d   :  { %1029 = vsyncpa [#allocation17], 1 }
 0x62e   :  { %1030 = vsyncpa [#allocation9], 1 }
 0x62f   :  { %1032 = vsyncpa [#allocation9 + $0x1], 1 }

</bundles_post_ra>
